<compile_context>
chip_gen: v7x
topology: tpu7x:2x2x1
jax: 0.10.0
libtpu: 0.0.40
codegen_flags: <defaults>
</compile_context>

<pallas_src>
import functools

import jax
import jax.numpy as jnp
from jax import lax
from jax.experimental import pallas as pl
from jax.experimental.pallas import tpu as pltpu

EPS = 1e-5
_INV_SQRT2 = 0.7071067811865476


def _gelu(y, approximate):
    if approximate:
        # tanh-approx GELU: transcendental goes to the EUP (otherwise idle slot).
        return jax.nn.gelu(y, approximate=True)
    # Exact erf GELU -- matches nn.GELU() default semantics.
    return 0.5 * y * (1.0 + lax.erf(y * jnp.float32(_INV_SQRT2)))


# --------------------------- fused single-pass kernel ---------------------------

def _fused_kernel(x_ref, gb_ref, w_ref, o_ref, *, inv_n, approximate_gelu):
    # x_ref: (1, C, HW)   gb_ref: (C, 2) [gamma|beta]   w_ref: (OK, C)
    # o_ref: (1, OK, HW)  -- HW on lanes, lane-dense stores.
    x = x_ref[0].astype(jnp.float32)                          # (C, HW)
    gb = gb_ref[...].astype(jnp.float32)                      # (C, 2)

    # InstanceNorm statistics over the full spatial extent.
    # Two-pass variance (mean((x-mean)^2)) -- robust to |mean| >> std channels.
    mean = jnp.sum(x, axis=-1, keepdims=True) * inv_n         # (C, 1)
    xc = x - mean
    var = jnp.sum(xc * xc, axis=-1, keepdims=True) * inv_n    # (C, 1)
    scale = gb[:, 0:1] * lax.rsqrt(var + EPS)                 # gamma * rsqrt(var+eps)
    y = xc * scale + gb[:, 1:2]                               # fused norm + affine

    y = _gelu(y, approximate_gelu)

    # Non-overlapping transposed conv == matmul over channels (MXU), f32 accumulate.
    out = jnp.dot(w_ref[...], y.astype(w_ref.dtype),
                  preferred_element_type=jnp.float32)         # (OK, HW)
    o_ref[0] = out.astype(o_ref.dtype)


# ----------------------- two-pass fallback (large slabs) ------------------------

def _stats_kernel(x_ref, gb_ref, scale_ref, shift_ref, sum_sc, sq_sc, *, inv_n):
    # x_ref: (1, C, T) tile of one batch item.
    # Accumulate per-lane partials (pure VPU adds each tile); a single cross-lane
    # XLU reduction happens only once, on the last tile.
    t = pl.program_id(1)

    @pl.when(t == 0)
    def _():
        sum_sc[...] = jnp.zeros_like(sum_sc)
        sq_sc[...] = jnp.zeros_like(sq_sc)

    x = x_ref[0].astype(jnp.float32)                          # (C, T)
    sum_sc[...] += x
    sq_sc[...] += x * x

    @pl.when(t == pl.num_programs(1) - 1)
    def _():
        gb = gb_ref[...].astype(jnp.float32)                  # (C, 2)
        mean = jnp.sum(sum_sc[...], axis=-1, keepdims=True) * inv_n
        ex2 = jnp.sum(sq_sc[...], axis=-1, keepdims=True) * inv_n
        # Single-pass biased variance (E[x^2] - mean^2), clamped at 0.  Slightly
        # less robust than the fused path's two-pass form for huge-mean channels.
        var = jnp.maximum(ex2 - mean * mean, 0.0)
        scale = gb[:, 0:1] * lax.rsqrt(var + EPS)
        scale_ref[0] = scale
        shift_ref[0] = gb[:, 1:2] - mean * scale


def _apply_kernel(x_ref, scale_ref, shift_ref, w_ref, o_ref, *, approximate_gelu):
    # x_ref: (1, C, T)   scale/shift: (1, C, 1)   w_ref: (OK, C)   o_ref: (1, OK, T)
    x = x_ref[0].astype(jnp.float32)                          # (C, T)
    y = x * scale_ref[0] + shift_ref[0]                       # fused norm+affine FMA
    y = _gelu(y, approximate_gelu)
    out = jnp.dot(w_ref[...], y.astype(w_ref.dtype),
                  preferred_element_type=jnp.float32)         # (OK, T) lane-dense
    o_ref[0] = out.astype(o_ref.dtype)


# ------------------------------- sizing helpers ---------------------------------

def _vmem_budget():
    """(fused-slab budget bytes, vmem_limit_bytes) derived from the chip's VMEM."""
    cap = 64 << 20  # conservative default (v7x physical VMEM per TensorCore)
    try:
        info = pltpu.get_tpu_info()
        cap = int(getattr(info, "vmem_capacity_bytes", cap))
    except Exception:
        pass
    vmem_limit = min(max(cap * 3 // 4, 16 << 20), 96 << 20, cap)
    slab_budget = vmem_limit // 2   # headroom for double-buffering & temporaries
    return slab_budget, vmem_limit


def _pick_lane_tile(hw, c, ok, out_bytes, batch):
    """Lane tile (multiple of 128 dividing hw) for the two-pass fallback path."""
    if hw % 128 != 0:
        # TODO(synk): pad HW up to a multiple of 128 (masking the stats tail) so the
        # ragged case also gets lane-dense stores; fall back to one ragged tile.
        return hw
    # Size T so the double-buffered in+out working set lands around ~4 MiB.
    per_lane = 2 * (c * 4 + ok * out_bytes) + 2 * c * 4
    target = max(128, ((4 << 20) // max(per_lane, 1)) // 128 * 128)
    t = min(hw, target)
    while hw % t != 0:
        t -= 128
    # Keep enough parallel grid steps to feed both v7x TensorCores even for tiny B.
    while batch * (hw // t) < 8 and t > 128 and t % 256 == 0:
        t //= 2
    return t


# ----------------------------------- wrapper -------------------------------------

def upscale_forward(x, gamma, beta, weight, scale, *,
                    approximate_gelu=False, mxu_bf16=True, out_dtype=None,
                    force_two_pass=False):
    """Upscale forward: InstanceNorm2d(affine) -> GELU -> ConvTranspose2d(k=s, stride=s).

    x: (B, C, H, W); weight: (C, out_c, scale, scale). Returns (B, out_c, H*s, W*s).
    """
    B, C, H, W = x.shape
    w_in_c, out_c, kH, kW = weight.shape
    assert w_in_c == C and kH == scale and kW == scale, (
        "Upscale kernel assumes a non-overlapping ConvTranspose2d (kernel == stride)")
    HW = H * W
    OK = out_c * scale * scale
    out_dtype = x.dtype if out_dtype is None else jnp.dtype(out_dtype)
    out_bytes = jnp.dtype(out_dtype).itemsize
    inv_n = 1.0 / float(HW)

    x_flat = x.reshape(B, C, HW)
    # (OK, C): MXU sees a plain (M,K)x(K,N) with the HW tile on N (lanes).
    w_okc = weight.reshape(C, OK).T
    w_okc = w_okc.astype(jnp.bfloat16 if mxu_bf16 else jnp.float32)
    gb = jnp.stack([gamma, beta], axis=1).astype(jnp.float32)      # (C, 2)

    slab_budget, vmem_limit = _vmem_budget()

    # Fused-path working set: x + output slabs (double-buffered) + f32 temporaries.
    fused_bytes = (2 * (C * HW * x.dtype.itemsize + OK * HW * out_bytes)
                   + 4 * C * HW * 4 + OK * C * w_okc.dtype.itemsize)
    use_fused = (not force_two_pass) and fused_bytes <= slab_budget

    if use_fused:
        # ---- single pass: x read from HBM exactly once ----
        out_flat = pl.pallas_call(
            functools.partial(_fused_kernel, inv_n=inv_n,
                              approximate_gelu=approximate_gelu),
            out_shape=jax.ShapeDtypeStruct((B, OK, HW), out_dtype),
            grid_spec=pltpu.PrefetchScalarGridSpec(
                num_scalar_prefetch=0,
                grid=(B,),
                in_specs=[
                    pl.BlockSpec((1, C, HW), lambda b: (b, 0, 0)),
                    pl.BlockSpec((C, 2), lambda b: (0, 0)),
                    pl.BlockSpec((OK, C), lambda b: (0, 0)),
                ],
                out_specs=pl.BlockSpec((1, OK, HW), lambda b: (b, 0, 0)),
            ),
            compiler_params=pltpu.CompilerParams(
                dimension_semantics=("parallel",),
                vmem_limit_bytes=vmem_limit),
        )(x_flat, gb, w_okc)
    else:
        # ---- two-pass fallback for slabs that do not fit VMEM ----
        T = _pick_lane_tile(HW, C, OK, out_bytes, B)
        n_t = HW // T

        scale_bc, shift_bc = pl.pallas_call(
            functools.partial(_stats_kernel, inv_n=inv_n),
            out_shape=(jax.ShapeDtypeStruct((B, C, 1), jnp.float32),
                       jax.ShapeDtypeStruct((B, C, 1), jnp.float32)),
            grid_spec=pltpu.PrefetchScalarGridSpec(
                num_scalar_prefetch=0,
                grid=(B, n_t),
                in_specs=[
                    pl.BlockSpec((1, C, T), lambda b, t: (b, 0, t)),
                    pl.BlockSpec((C, 2), lambda b, t: (0, 0)),
                ],
                out_specs=(
                    pl.BlockSpec((1, C, 1), lambda b, t: (b, 0, 0)),
                    pl.BlockSpec((1, C, 1), lambda b, t: (b, 0, 0)),
                ),
                scratch_shapes=[pltpu.VMEM((C, T), jnp.float32),
                                pltpu.VMEM((C, T), jnp.float32)],
            ),
            compiler_params=pltpu.CompilerParams(
                dimension_semantics=("parallel", "arbitrary"),
                vmem_limit_bytes=vmem_limit),
        )(x_flat, gb)

        out_flat = pl.pallas_call(
            functools.partial(_apply_kernel, approximate_gelu=approximate_gelu),
            out_shape=jax.ShapeDtypeStruct((B, OK, HW), out_dtype),
            grid_spec=pltpu.PrefetchScalarGridSpec(
                num_scalar_prefetch=0,
                grid=(B, n_t),
                in_specs=[
                    pl.BlockSpec((1, C, T), lambda b, t: (b, 0, t)),
                    pl.BlockSpec((1, C, 1), lambda b, t: (b, 0, 0)),
                    pl.BlockSpec((1, C, 1), lambda b, t: (b, 0, 0)),
                    pl.BlockSpec((OK, C), lambda b, t: (0, 0)),
                ],
                out_specs=pl.BlockSpec((1, OK, T), lambda b, t: (b, 0, t)),
            ),
            compiler_params=pltpu.CompilerParams(
                dimension_semantics=("parallel", "parallel"),
                vmem_limit_bytes=vmem_limit),
        )(x_flat, scale_bc, shift_bc, w_okc)

    # (B, OK, HW) -> (B, out_c, s, s, H, W) -> (B, out_c, H, s, W, s) -> NCHW up.
    # TODO(synk): emit the interleaved NCHW layout directly from the kernel
    # (row-tiled output + in-VMEM (kh, kw) rearrangement) to remove this XLA
    # transpose, which costs one extra read+write of the largest tensor.
    out = out_flat.reshape(B, out_c, scale, scale, H, W)
    out = out.transpose(0, 1, 4, 2, 5, 3).reshape(B, out_c, H * scale, W * scale)
    return out


# ---------------------------------- reference ------------------------------------

def _reference(x, gamma, beta, weight, scale):
    # Pure-JAX reference (InstanceNorm2d affine + exact GELU + ConvTranspose2d).
    B, C, H, W = x.shape
    mean = x.mean(axis=(2, 3), keepdims=True)
    var = ((x - mean) ** 2).mean(axis=(2, 3), keepdims=True)
    y = (x - mean) * lax.rsqrt(var + EPS)
    y = y * gamma[None, :, None, None] + beta[None, :, None, None]
    y = 0.5 * y * (1.0 + lax.erf(y / jnp.sqrt(2.0)))
    out = jnp.einsum("bchw,coij->bohiwj", y, weight)
    out_c = weight.shape[1]
    return out.reshape(B, out_c, H * scale, W * scale)


if __name__ == "__main__":
    key = jax.random.PRNGKey(0)
    B, in_c, out_c, H, W, scale = 2, 8, 4, 16, 16, 2

    k1, k2, k3, k4 = jax.random.split(key, 4)
    x = jax.random.normal(k1, (B, in_c, H, W), dtype=jnp.float32)
    gamma = 1.0 + 0.1 * jax.random.normal(k2, (in_c,), dtype=jnp.float32)
    beta = 0.1 * jax.random.normal(k3, (in_c,), dtype=jnp.float32)
    # ConvTranspose2d weight shape: (in_c, out_c, kH, kW)
    weight = 0.2 * jax.random.normal(k4, (in_c, out_c, scale, scale), dtype=jnp.float32)

    ref = _reference(x, gamma, beta, weight, scale)

    # 1) Fused single-pass kernel with bf16 MXU operands (default fast path).
    out = jax.block_until_ready(upscale_forward(x, gamma, beta, weight, scale))
    assert out.shape == (B, out_c, H * scale, W * scale)
    assert jnp.allclose(out, ref, atol=2e-2, rtol=2e-2)

    # 2) Fused kernel with exact f32 matmul (bit-faithful to the PyTorch module).
    out_f32 = jax.block_until_ready(
        upscale_forward(x, gamma, beta, weight, scale, mxu_bf16=False))
    assert jnp.allclose(out_f32, ref, atol=2e-4, rtol=2e-4)

    # 3) Two-pass fallback path (stats + apply) with multiple lane tiles, exercising
    #    the reduction grid axis and the tiled lane-dense stores.
    out_2p = jax.block_until_ready(
        upscale_forward(x, gamma, beta, weight, scale, force_two_pass=True,
                        mxu_bf16=False))
    assert jnp.allclose(out_2p, ref, atol=2e-4, rtol=2e-4)

    print("KERNEL_OK")
</pallas_src>

<mosaic_0001>
module attributes {stable_mosaic.version = 11 : i64} {
  func.func @_fused_kernel(%arg0: i32, %arg1: memref<1x8x256xf32, #tpu.memory_space<vmem>>, %arg2: memref<8x2xf32, #tpu.memory_space<vmem>>, %arg3: memref<16x8xbf16, #tpu.memory_space<vmem>>, %arg4: memref<1x16x256xf32, #tpu.memory_space<vmem>>) attributes {dimension_semantics = [#tpu.dimension_semantics<parallel>], iteration_bounds = array<i64: 2>, scalar_prefetch = 0 : i64, scratch_operands = 0 : i64, tpu.core_type = #tpu.core_type<tc>, window_params = [{transform_indices = @transform_0, window_bounds = array<i64: 1, 8, 256>}, {pipeline_mode = #tpu.pipeline_mode<synchronous>, transform_indices = @transform_1, window_bounds = array<i64: 8, 2>}, {pipeline_mode = #tpu.pipeline_mode<synchronous>, transform_indices = @transform_2, window_bounds = array<i64: 16, 8>}, {transform_indices = @transform_3, window_bounds = array<i64: 1, 16, 256>}]} {
    %c0 = arith.constant 0 : index
    %c0_0 = arith.constant 0 : index
    %c0_1 = arith.constant 0 : index
    %0 = vector.load %arg1[%c0, %c0_0, %c0_1] : memref<1x8x256xf32, #tpu.memory_space<vmem>>, vector<1x8x256xf32>
    %1 = vector.shape_cast %0 : vector<1x8x256xf32> to vector<8x256xf32>
    %c0_2 = arith.constant 0 : index
    %c0_3 = arith.constant 0 : index
    %2 = vector.load %arg2[%c0_2, %c0_3] : memref<8x2xf32, #tpu.memory_space<vmem>>, vector<8x2xf32>
    %cst = arith.constant dense<0.000000e+00> : vector<8xf32>
    %3 = vector.multi_reduction <add>, %1, %cst [1] : vector<8x256xf32> to vector<8xf32>
    %4 = vector.shape_cast %3 : vector<8xf32> to vector<8x1xf32>
    %cst_4 = arith.constant 3.906250e-03 : f32
    %5 = vector.broadcast %cst_4 : f32 to vector<8x1xf32>
    %6 = arith.mulf %4, %5 : vector<8x1xf32>
    %7 = vector.broadcast %6 : vector<8x1xf32> to vector<8x256xf32>
    %8 = arith.subf %1, %7 : vector<8x256xf32>
    %9 = arith.mulf %8, %8 : vector<8x256xf32>
    %cst_5 = arith.constant dense<0.000000e+00> : vector<8xf32>
    %10 = vector.multi_reduction <add>, %9, %cst_5 [1] : vector<8x256xf32> to vector<8xf32>
    %11 = vector.shape_cast %10 : vector<8xf32> to vector<8x1xf32>
    %cst_6 = arith.constant 3.906250e-03 : f32
    %12 = vector.broadcast %cst_6 : f32 to vector<8x1xf32>
    %13 = arith.mulf %11, %12 : vector<8x1xf32>
    %14 = vector.extract_strided_slice %2 {offsets = [0, 0], sizes = [8, 1], strides = [1, 1]} : vector<8x2xf32> to vector<8x1xf32>
    %cst_7 = arith.constant 9.99999974E-6 : f32
    %15 = vector.broadcast %cst_7 : f32 to vector<8x1xf32>
    %16 = arith.addf %13, %15 : vector<8x1xf32>
    %17 = math.rsqrt %16 : vector<8x1xf32>
    %18 = arith.mulf %14, %17 : vector<8x1xf32>
    %19 = vector.broadcast %18 : vector<8x1xf32> to vector<8x256xf32>
    %20 = arith.mulf %8, %19 : vector<8x256xf32>
    %21 = vector.extract_strided_slice %2 {offsets = [0, 1], sizes = [8, 1], strides = [1, 1]} : vector<8x2xf32> to vector<8x1xf32>
    %22 = vector.broadcast %21 : vector<8x1xf32> to vector<8x256xf32>
    %23 = arith.addf %20, %22 : vector<8x256xf32>
    %cst_8 = arith.constant 5.000000e-01 : f32
    %24 = vector.broadcast %cst_8 : f32 to vector<8x256xf32>
    %25 = arith.mulf %24, %23 : vector<8x256xf32>
    %cst_9 = arith.constant 0.707106769 : f32
    %26 = vector.broadcast %cst_9 : f32 to vector<8x256xf32>
    %27 = arith.mulf %23, %26 : vector<8x256xf32>
    %28 = math.erf %27 : vector<8x256xf32>
    %cst_10 = arith.constant 1.000000e+00 : f32
    %29 = vector.broadcast %cst_10 : f32 to vector<8x256xf32>
    %30 = arith.addf %29, %28 : vector<8x256xf32>
    %31 = arith.mulf %25, %30 : vector<8x256xf32>
    %c0_11 = arith.constant 0 : index
    %c0_12 = arith.constant 0 : index
    %32 = vector.load %arg3[%c0_11, %c0_12] : memref<16x8xbf16, #tpu.memory_space<vmem>>, vector<16x8xbf16>
    %33 = arith.truncf %31 : vector<8x256xf32> to vector<8x256xbf16>
    %cst_13 = arith.constant dense<0.000000e+00> : vector<16x256xf32>
    %34 = tpu.matmul %32, %33, %cst_13 {dimension_numbers = #tpu.dot_dimension_numbers<[1], [0], [0], [1], [0, 0, 1, 1], [], []>} : vector<16x8xbf16>, vector<8x256xbf16>, vector<16x256xf32> -> vector<16x256xf32>
    %c0_14 = arith.constant 0 : index
    %c0_15 = arith.constant 0 : index
    %c0_16 = arith.constant 0 : index
    %35 = vector.load %arg4[%c0_14, %c0_15, %c0_16] : memref<1x16x256xf32, #tpu.memory_space<vmem>>, vector<1x16x256xf32>
    %36 = vector.shape_cast %35 : vector<1x16x256xf32> to vector<16x256xf32>
    %37 = vector.shape_cast %34 : vector<16x256xf32> to vector<1x16x256xf32>
    tpu.vector_store %arg4[%c0_14, %c0_15, %c0_16], %37 {strides = array<i32>} : memref<1x16x256xf32, #tpu.memory_space<vmem>>, vector<1x16x256xf32>,
    return
  }
  func.func @transform_0(%arg0: i32) -> (i32, i32, i32) {
    %c0_i32 = arith.constant 0 : i32
    %c0_i32_0 = arith.constant 0 : i32
    %c0_i32_1 = arith.constant 0 : i32
    return %arg0, %c0_i32, %c0_i32_0 : i32, i32, i32
  }
  func.func @transform_1(%arg0: i32) -> (i32, i32) {
    %c0_i32 = arith.constant 0 : i32
    %c0_i32_0 = arith.constant 0 : i32
    %c0_i32_1 = arith.constant 0 : i32
    return %c0_i32, %c0_i32_0 : i32, i32
  }
  func.func @transform_2(%arg0: i32) -> (i32, i32) {
    %c0_i32 = arith.constant 0 : i32
    %c0_i32_0 = arith.constant 0 : i32
    %c0_i32_1 = arith.constant 0 : i32
    return %c0_i32, %c0_i32_0 : i32, i32
  }
  func.func @transform_3(%arg0: i32) -> (i32, i32, i32) {
    %c0_i32 = arith.constant 0 : i32
    %c0_i32_0 = arith.constant 0 : i32
    %c0_i32_1 = arith.constant 0 : i32
    return %arg0, %c0_i32, %c0_i32_0 : i32, i32, i32
  }
}

</mosaic_0001>

<bundles_post_ra>
// kernel: tpu_custom_call.1
= control target key start
LH: loop header
LB: loop body
LE: loop exit
PB: predicated region body
PF: predicated region fallthrough
CT: control target
= control target key end

     0   :  { %8 = vsyncpa [#allocation3], 0  ;;  %s757_s0 = inlined_call_operand.hbm [shape: f32[2,8,256], index: 0, kind: input, shape index: {}]   ;;  %s758_s1 = inlined_call_operand.vmem [shape: f32[8,2], index: 1, kind: input, shape index: {}]   ;;  %s759_s2 = inlined_call_operand.vmem [shape: bf16[16,8], index: 2, kind: input, shape index: {}]   ;;  %s760_s3 = inlined_call_operand.hbm [shape: f32[2,16,256], index: 3, kind: output, shape index: {}]  }
   0x1   :  { %10 = vsyncpa [#allocation3 + $0x1], 0 }
   0x2   :  { %11 = vsyncpa [#allocation4], 0 }
   0x3   :  { %13 = vsyncpa [#allocation4 + $0x1], 0  ;;  %s587_s12 = smov 0   ;;  %s589_s13 = smov 0  }
   0x4   :  { %s591_s14 = smov 0   ;;  %s593_s15 = smov 0  }
   0x5 LB: > { %s608_s16 = sadd.s32 4294967295, %s559_s15   ;;  %s384_s17 = sadd.s32 4294967294, %s559_s15   ;;  %s559_s15 = sphi %s593_s15, %s775_s15   ;;  %s555_s14 = sphi %s591_s14, %s774_s14   ;;  %s551_s13 = sphi %s589_s13, %s773_s13   ;;  %s547_s12 = sphi %s587_s12, %s772_s12  }
   0x6   : > { %s612_s18 = sadd.s32 1, %s559_s15   ;;  %s26_s19 = sadd.s32 1, %s555_s14 }
   0x7   : > { %s23_s20 = ssub.s32 %s559_s15, %s612_s18  ;;  %p33_p0 = scmp.ne.s32.totalorder %s555_s14, %s551_s13 }
   0x8   : > { %p24_p1 = scmp.eq.s32.totalorder %s23_s20, 0  ;;  %p34_p2 = scmp.eq.s32.totalorder %s559_s15, 0 }
   0x9   : > { %p39_p3 = scmp.ne.s32.totalorder %s551_s13, %s547_s12  ;;  %p40_p4 = scmp.eq.s32.totalorder %s608_s16, 0 }
   0xa   : > { %s624_s21 = scalar_select %p24_p1, %s555_s14, %s26_s19  }
   0xb   : > { %p626_p5 = por %p34_p2, %p33_p0  ;;  %p630_p6 = por %p40_p4, %p39_p3 }
   0xc   : > { %p105_p7 = scmp.eq.s32.totalorder %s608_s16, 1  ;;  %p111_p8 = scmp.eq.s32.totalorder %s384_s17, 1 }
   0xd   : > { %p415_p10 = scmp.lt.s32.totalorder %s559_s15, 2  ;;  %s137_s26 = sand.u32 1, %s555_s14  }
   0xe   : > { %p637_p11 = por %p105_p7, %p33_p0  ;;  %p641_p12 = por %p111_p8, %p39_p3 }
   0xf   : > { %s401_s27 = sshll.u32 %s559_s15, 8  ;;  %s387_s28 = sshll.u32 %s137_s26, 4 }
  0x10   : > { %s764_s24 = scalar_select %p637_p11, 1, 0 }
  0x11   : > { %s765_s25 = scalar_select %p641_p12, 1, 0 }
  0x12   : > { %s650_s4 = scalar_lea.hbm %s757_s0, %s401_s27  ;;  %s141_s5 = scalar_lea.vmem [#allocation2], %s387_s28 }
  0x13   : > { %s149_s6 = sshll.u32 %s141_s5, 4  ;;  %p654_p13 = pnand %p415_p10, %p626_p5  ;;  %s658_s6 = int_to_ptr.vmem [resolvable:$true] %s149_s6 }
  0x14   : > { %s138_s8 = scalar_lea.sflag [#allocation3], %s137_s26  ;;  %s463_s9 = scalar_lea.hbm %s650_s4, 256 }
  0x15   : > { %p464_p2 = scmp.ne.s32.totalorder %s650_s4, %s463_s9  ;;  %p465_p3 = pneg %p654_p13 }
  0x16   : > { %s468_s17 = scalar_lea.hbm %s757_s0, 512  ;;  %p469_p5 = scmp.lt.u32.totalorder %s650_s4, %s757_s0 }
  0x17   : > { %p466_p4 = pnand %p465_p3, %p464_p2  ;;  %p470_p8 = scmp.lt.u32.totalorder %s468_s17, %s463_s9 }
  0x18   : > { %p472_p9 = scmp.lt.u32.totalorder %s463_s9, %s650_s4 }
  0x19   : > { %p467_p7 = pneg %p466_p4  ;;  %p471_p10 = por %p470_p8, %p469_p5 }
  0x1b   : > { %p473_p0 = por %p472_p9, %p471_p10 }
  0x1d   : > { %p474_p1 = pnand %p473_p0, %p467_p7 }
  0x1f   : > { %477 = shalt.err (!%p474_p1)
}
  0x20   : > { %s478_s22 = scalar_lea.vmem %s658_s6, 256  ;;  %s561_s26 = smov [#allocation2]  }
  0x21   : > { %p479_p2 = scmp.ne.s32.totalorder %s658_s6, %s478_s22  ;;  %s483_s27 = sshll.u32 %s561_s26, 4  ;;  %s484_s27 = int_to_ptr.vmem [resolvable:$false] %s483_s27 }
  0x22   : > { %s485_s28 = scalar_lea.vmem %s484_s27, 512  ;;  %p486_p11 = scmp.lt.s32.totalorder %s658_s6, %s484_s27 }
  0x23   : > { %p481_p4 = pnand %p479_p2, %p465_p3  ;;  %p487_p5 = scmp.lt.s32.totalorder %s485_s28, %s478_s22 }
  0x25   : > { %p482_p12 = pneg %p481_p4  ;;  %p488_p8 = por %p487_p5, %p486_p11 }
  0x27   : > { %p489_p9 = pnand %p488_p8, %p482_p12 }
  0x29   : > { %492 = shalt.err (!%p489_p9)
}
  0x2a   : > { %410 = dma.hbm_to_vmem [thread:$0]  (!%p654_p13), %s650_s4, 256, %s658_s6, %s138_s8  }
  0x2b   : > { %p767_p0 = scmp.lt.s32.totalorder %s559_s15, 3  ;;  %p768_p1 = scmp.ge.s32.totalorder %s559_s15, 1 }
  0x2d   : > { %p155_p3 = pnand %p768_p1, %p767_p0 }
  0x2e   : > { %s692_s29 = sand.u32 (!%p155_p3), 1, %s551_s13  }
  0x2f   : > { %158 = sbr.rel (%p155_p3) target bundleno = 756 (0x2f4), region = 32  ;;  %s391_s30 = sshll.u32 (!%p155_p3), %s692_s29, 4 }
  0x30   : > { %s161_s5 = scalar_lea.sflag (!%p155_p3), [#allocation3], %s692_s29  ;;  %s164_s9 = scalar_lea.vmem (!%p155_p3), [#allocation2], %s391_s30 }
  0x36   : > { %538 = dma.done.wait (%p630_p6), %s161_s5, 256  }
  0x37   : > { %540 = vsyncadd (%p630_p6), %s161_s5, 4294967040  ;;  %v188_v0 = vld [vmem:[%s164_s9] sm:$0xff]  ;;  %v189_v1 = vld [vmem:[%s164_s9 + $0x8] sm:$0xff]  ;;  %v562_v10 = vmov 0   ;;  %v563_v11 = vmov 1   ;;  %vm243_vm0 = vcmask 1043456  }
  0x38   : > { %v191_v2 = vadd.f32 %v189_v1, %v188_v0  ;;  %453 = vset.pattern.permute.xlu1 %v562_v10  ;;  %282 = vmatprep.mubr.bf16.mxu0 %v562_v10  ;;  %v190_v15 = vld [vmem:[%s758_s1] sm:$0xff]  ;;  %vm239_vm1 = vcmask 64512   ;;  %s392_s8 = sshll.u32 %s692_s29, 5  ;;  %s402_s17 = sshll.u32 %s608_s16, 9 }
  0x39   : > { %455 = vset.pattern.permute.xlu0 %v563_v11  ;;  %v456_v37 = vld [vmem:[%s759_s2] sm:$0xff]   ;;  %s186_s10 = scalar_lea.vmem [#allocation5], %s392_s8  ;;  %s713_s22 = scalar_lea.hbm %s760_s3, %s402_s17 }
  0x3a   : > { %192 = vadd.xlane.f32.xlu0 %v191_v2  ;;  %s311_s11 = sshll.u32 %s186_s10, 4  ;;  %s298_s26 = scalar_lea.sflag [#allocation4], %s692_s29  ;;  %s708_s11 = int_to_ptr.vmem [resolvable:$true] %s311_s11 }
  0x3b   : > { %s493_s16 = scalar_lea.vmem %s708_s11, 512  ;;  %p769_p11 = scmp.ne.s32.totalorder %s764_s24, 0 }
  0x3c   : > { %p494_p6 = scmp.ne.s32.totalorder %s708_s11, %s493_s16  ;;  %s564_s27 = smov [#allocation5]  }
  0x3d   : > { %s497_s28 = sshll.u32 %s564_s27, 4  ;;  %s498_s28 = int_to_ptr.vmem [resolvable:$false] %s497_s28 }
  0x3e   : > { %p495_p12 = pnand %p494_p6, %p769_p11  ;;  %s499_s30 = scalar_lea.vmem %s498_s28, 1024 }
  0x3f   : > { %p500_p7 = scmp.lt.s32.totalorder %s708_s11, %s498_s28  ;;  %p501_p10 = scmp.lt.s32.totalorder %s499_s30, %s493_s16 }
  0x40   : > { %p496_p13 = pneg %p495_p12 }
  0x41   : > { %p502_p2 = por %p501_p10, %p500_p7 }
  0x43   : > { %p503_p4 = pnand %p502_p2, %p496_p13 }
  0xc7   : > { %v193_v3 = vpop.xlane.xlu0 %192 }
  0xc8   : > { %v194_v4 = vmul.f32 0.00390625, %v193_v3 }
  0xca   : > { %v195_v5 = vsub.f32 %v188_v0, %v194_v4  ;;  %v196_v6 = vsub.f32 %v189_v1, %v194_v4 }
  0xcc   : > { %v197_v7 = vmul.f32 %v195_v5, %v195_v5  ;;  %v198_v8 = vmul.f32 %v196_v6, %v196_v6 }
  0xce   : > { %v199_v9 = vadd.f32 %v198_v8, %v197_v7 }
  0xd0   : > { %200 = vadd.xlane.f32.xlu0 %v199_v9 }
 0x15d   : > { %v201_v12 = vpop.xlane.xlu0 %200 }
 0x15e   : > { %v202_v13 = vmul.f32 0.00390625, %v201_v12 }
 0x160   : > { %v203_v14 = vadd.f32 1e-05, %v202_v13 }
 0x162   : > { %457 = vrsqrt.f32 %v203_v14 }
 0x16c   : > { %v458_v16 = vpop.eup %457 }
 0x16d   : > { %v205_v17 = vmul.f32 %v458_v16, %v190_v15 }
 0x16f   : > { %208 = vperm.xlu1 %453, %v205_v17  }
 0x173   : > { %454 = vset.pattern.permute.xlu1 %v563_v11 }
 0x174   : > { %215 = vperm.xlu1 %454, %v190_v15  }
 0x1ee   : > { %v209_v18 = vpop.permute.xlu1 %208 }
 0x1ef   : > { %v211_v19 = vmul.f32 %v209_v18, %v195_v5  ;;  %v212_v20 = vmul.f32 %v209_v18, %v196_v6 }
 0x1f3   : > { %v216_v21 = vpop.permute.xlu1 %215 }
 0x1f4   : > { %v218_v22 = vadd.f32 %v216_v21, %v211_v19  ;;  %v219_v23 = vadd.f32 %v216_v21, %v212_v20 }
 0x1f6   : > { %v222_v24 = vmul.f32 0.70710677, %v218_v22  ;;  %v223_v25 = vmul.f32 0.70710677, %v219_v23  ;;  %v220_v28 = vmul.f32 0.5, %v218_v22  ;;  %v221_v30 = vmul.f32 0.5, %v219_v23 }
 0x1f8   : > { %459 = verf.f32 %v222_v24 }
 0x1f9   : > { %461 = verf.f32 %v223_v25 }
 0x202   : > { %v460_v26 = vpop.eup %459 }
 0x203   : > { %v462_v27 = vpop.eup %461  ;;  %v226_v29 = vadd.f32 1.0, %v460_v26 }
 0x204   : > { %v227_v31 = vadd.f32 1.0, %v462_v27 }
 0x205   : > { %v228_v32 = vmul.f32 %v226_v29, %v220_v28 }
 0x206   : > { %v229_v33 = vmul.f32 %v227_v31, %v221_v30 }
 0x207   : > { %v232_v34 = vpack.c.bf16 %v228_v32, %v228_v32 }
 0x208   : > { %v233_v35 = vpack.c.bf16 %v229_v33, %v229_v33 }
 0x209   : > { %v245_v36 = vsel %vm243_vm0, %v232_v34, 0 }
 0x20a   : > { %394 = vmatprep.subr.msk.bf16.mxu0 %vm243_vm0, %v233_v35 }
 0x20b   : > { %251 = vmatpush1.bf16.msra.mxu0 %v245_v36 }
 0x20e   : > { %395 = vmatmul.mubr.msk.bf16.vlgmr.msra.gmra.mrb[0].mxu0 %vm239_vm1, %v456_v37 }
 0x2e1   : > { %v284_v38 = vpop.f32.mrb[0].mxu0 }
 0x2e2   : > { %293 = vst [vmem:[%s186_s10] sm:$0xff] %v284_v38  ;;  %v286_v39 = vpop.f32.mrb[1].mxu0 }
 0x2e3   : > { %294 = vst [vmem:[%s186_s10 + $0x8] sm:$0xff] %v286_v39  ;;  %v288_v40 = vpop.f32.mrb[2].mxu0 }
 0x2e4   : > { %295 = vst [vmem:[%s186_s10 + $0x10] sm:$0xff] %v288_v40  ;;  %v290_v41 = vpop.f32.mrb[3].mxu0 }
 0x2e5   : > { %296 = vst [vmem:[%s186_s10 + $0x18] sm:$0xff] %v290_v41 }
 0x2e6   : > { %506 = shalt.err (!%p503_p4)
}
 0x2e7   : > { %s507_s5 = scalar_lea.hbm %s713_s22, 512  ;;  %s511_s4 = scalar_lea.hbm %s760_s3, 1024 }
 0x2e8   : > { %p508_p5 = scmp.ne.s32.totalorder %s713_s22, %s507_s5  ;;  %p512_p0 = scmp.lt.u32.totalorder %s713_s22, %s760_s3 }
 0x2e9   : > { %p513_p1 = scmp.lt.u32.totalorder %s511_s4, %s507_s5  ;;  %p515_p6 = scmp.lt.u32.totalorder %s507_s5, %s713_s22 }
 0x2ea   : > { %p509_p8 = pnand %p508_p5, %p769_p11 }
 0x2eb   : > { %p514_p3 = por %p513_p1, %p512_p0 }
 0x2ec   : > { %p510_p9 = pneg %p509_p8 }
 0x2ed   : > { %p516_p12 = por %p515_p6, %p514_p3 }
 0x2ef   : > { %p517_p13 = pnand %p516_p12, %p510_p9 }
 0x2f1   : > { %520 = shalt.err (!%p517_p13)
}
 0x2f2   : > { %s565_s8 = smov 256   ;;  %s566_s10 = smov 16  }
 0x2f3   : > { %405 = dma.vmem_to_hbm [thread:$0]  (%p769_p11), %s708_s11, 512, %s713_s22, %s298_s26, %s565_s8, %s565_s8, %s566_s10  }
 0x2f4 PF: > { %s326_s17 = sand.u32 1, %s547_s12   ;;  %p770_p7 = scmp.ne.s32.totalorder %s765_s25, 0 }
 0x2f5   : > { %p771_p10 = scmp.ge.s32.totalorder %s559_s15, 2  ;;  %s327_s19 = scalar_lea.sflag [#allocation4], %s326_s17 }
 0x2f7   : > { %p412_p2 = pnand %p771_p10, %p770_p7 }
 0x2f9   : > { %542 = dma.done.wait (!%p412_p2), %s327_s19, 512  }
 0x2fa   : > { %544 = vsyncadd (!%p412_p2), %s327_s19, 4294966784  ;;  %p16_p4 = scmp.ge.s32.totalorder %s612_s18, 4   ;;  %s772_s12 = smov %s551_s13 }
 0x2fb   : > { %s773_s13 = smov %s555_s14  ;;  %s774_s14 = smov %s624_s21 }
 0x2fc   : > { %s775_s15 = smov %s612_s18  ;;  %18 = sbr.rel (!%p16_p4) target bundleno = 5 (0x5), region = 77 }
 0x303   :  { %332 = vsyncpa [#allocation3], 1 }
 0x304   :  { %334 = vsyncpa [#allocation3 + $0x1], 1 }
 0x305   :  { %335 = vsyncpa [#allocation4], 1 }
 0x306   :  { %337 = vsyncpa [#allocation4 + $0x1], 1 }

</bundles_post_ra>
